<compile_context>
chip_gen: v7x
topology: tpu7x:2x2x1
jax: 0.10.0
libtpu: 0.0.40
codegen_flags: <defaults>
</compile_context>

<pallas_src>
import functools

import jax
import jax.numpy as jnp
from jax import lax
from jax.experimental import pallas as pl
from jax.experimental.pallas import tpu as pltpu

EPS = 1e-6  # matches LayerNormalization(features, eps=1e-6)

# Total pipelined-VMEM target for tile sizing; safe on v5e/v6e (128 MiB) and
# v7x (64 MiB physical, 32 MiB scoped default).
_VMEM_BUDGET_BYTES = 24 * 1024 * 1024
# Raise v5e's 16 MiB scoped default; still within every generation's physical VMEM.
_VMEM_LIMIT_BYTES = 32 * 1024 * 1024
_MAX_BLOCK_ROWS = 1024


def _pick_block_rows(rows, width, itemsize, n_streams):
    """Largest row-tile that keeps `n_streams` double-buffered streams in budget."""
    tile_bytes = _VMEM_BUDGET_BYTES // (2 * n_streams)
    target = max(8, tile_bytes // max(1, width * itemsize))
    target = min(int(target), _MAX_BLOCK_ROWS)
    if target >= rows:
        return rows                      # one block covering all rows (full dim is legal)
    return max(8, (target // 8) * 8)     # multiple of 8 sublanes; tail block is masked


# --------------------------- Pallas kernels ---------------------------------

def _layernorm_kernel(x_ref, alpha_ref, bias_ref, o_ref):
    """Per-row LayerNorm: alpha * (x - mean) / (std + eps) + bias.

    NOTE: unbiased std (ddof=1) and eps added to std, matching the custom
    PyTorch LayerNormalization in the reference model.
    """
    x = x_ref[...].astype(jnp.float32)
    d = x.shape[-1]
    mean = jnp.mean(x, axis=-1, keepdims=True)
    centered = x - mean
    var = jnp.sum(centered * centered, axis=-1, keepdims=True) * (1.0 / (d - 1))
    inv = 1.0 / (jnp.sqrt(var) + EPS)
    o_ref[...] = (alpha_ref[...] * (centered * inv) + bias_ref[...]).astype(o_ref.dtype)


def _mix32(x):
    """splitmix32-style finalizer on uint32 arrays."""
    x = x ^ (x >> jnp.uint32(16))
    x = x * jnp.uint32(0x7FEB352D)
    x = x ^ (x >> jnp.uint32(15))
    x = x * jnp.uint32(0x846CA68B)
    x = x ^ (x >> jnp.uint32(16))
    return x


def _make_residual_kernel(*, block_rows, p, training):
    """out = x + dropout(y); inverted dropout with keep-prob scaling.

    Dropout mask comes from a counter-based hash of (seed, global element
    index): deterministic per seed, independent per element, and independent
    of grid execution order (so the grid axis can be "parallel").
    """
    apply_dropout = bool(training) and 0.0 < p < 1.0
    drop_all = bool(training) and p >= 1.0
    scale = 1.0 / (1.0 - p) if apply_dropout else 1.0
    # P(bits < threshold) = p ; p == 1 is special-cased above, so no uint32 overflow.
    threshold = min(int(round(p * 4294967296.0)), 4294967295)

    def kernel(seed_ref, x_ref, y_ref, o_ref):
        x = x_ref[...]
        if drop_all:                       # p >= 1: dropout zeroes everything
            o_ref[...] = x
            return
        y = y_ref[...]
        if apply_dropout:
            shape = y.shape
            row0 = (pl.program_id(0) * block_rows).astype(jnp.uint32)
            rows_i = lax.broadcasted_iota(jnp.int32, shape, 0).astype(jnp.uint32) + row0
            cols_i = lax.broadcasted_iota(jnp.int32, shape, 1).astype(jnp.uint32)
            seed = seed_ref[0].astype(jnp.uint32)
            h = (rows_i * jnp.uint32(0x9E3779B1)
                 + cols_i * jnp.uint32(0x85EBCA77)
                 + seed * jnp.uint32(0xC2B2AE3D))
            bits = _mix32(_mix32(h))
            keep = bits >= jnp.uint32(threshold)
            # Math stays in the input dtype (bf16-native on v6e/v7x, f32 otherwise).
            y = jnp.where(keep, y * scale, 0.0)
        o_ref[...] = (x + y).astype(o_ref.dtype)

    return kernel


# --------------------------- pallas_call wrappers ----------------------------

def layer_norm(x2d, alpha, bias):
    n, d = x2d.shape
    block_rows = _pick_block_rows(n, d, x2d.dtype.itemsize, n_streams=2)
    return pl.pallas_call(
        _layernorm_kernel,
        out_shape=jax.ShapeDtypeStruct((n, d), x2d.dtype),
        grid=(pl.cdiv(n, block_rows),),
        in_specs=[
            pl.BlockSpec((block_rows, d), lambda i: (i, 0)),
            pl.BlockSpec((1, d), lambda i: (0, 0)),
            pl.BlockSpec((1, d), lambda i: (0, 0)),
        ],
        out_specs=pl.BlockSpec((block_rows, d), lambda i: (i, 0)),
        compiler_params=pltpu.CompilerParams(
            dimension_semantics=("parallel",),
            vmem_limit_bytes=_VMEM_LIMIT_BYTES),
    )(x2d, alpha.reshape(1, d).astype(jnp.float32), bias.reshape(1, d).astype(jnp.float32))


def residual_dropout_add(x2d, y2d, *, seed, p, training):
    n, d = x2d.shape
    total = n * d

    # Present a lane-dense trailing dim (multiple of 128) to the elementwise kernel.
    if d % 128 == 0:
        xe, ye, rows, width, reshaped = x2d, y2d, n, d, False
    else:
        width = 128
        pad = (-total) % width
        xf, yf = x2d.reshape(-1), y2d.reshape(-1)
        if pad:
            xf = jnp.pad(xf, (0, pad))
            yf = jnp.pad(yf, (0, pad))
        rows = (total + pad) // width
        xe, ye, reshaped = xf.reshape(rows, width), yf.reshape(rows, width), True

    block_rows = _pick_block_rows(rows, width, xe.dtype.itemsize, n_streams=3)
    kernel = _make_residual_kernel(block_rows=block_rows, p=p, training=training)

    out = pl.pallas_call(
        kernel,
        out_shape=jax.ShapeDtypeStruct((rows, width), xe.dtype),
        grid_spec=pltpu.PrefetchScalarGridSpec(
            num_scalar_prefetch=1,  # scalar seed lands in SMEM
            grid=(pl.cdiv(rows, block_rows),),
            in_specs=[
                pl.BlockSpec((block_rows, width), lambda i, seed_ref: (i, 0)),
                pl.BlockSpec((block_rows, width), lambda i, seed_ref: (i, 0)),
            ],
            out_specs=pl.BlockSpec((block_rows, width), lambda i, seed_ref: (i, 0)),
        ),
        compiler_params=pltpu.CompilerParams(
            dimension_semantics=("parallel",),
            vmem_limit_bytes=_VMEM_LIMIT_BYTES),
    )(jnp.asarray([seed], jnp.int32), xe, ye)

    if reshaped:
        out = out.reshape(-1)[:total].reshape(n, d)
    return out


# --------------------------- module equivalent -------------------------------

class ResidualConnection:
    """JAX/Pallas equivalent of the PyTorch ResidualConnection module."""

    def __init__(self, features: int, dropout: float) -> None:
        self.features = int(features)
        self.p = float(dropout)
        # LayerNormalization parameters (alpha=ones, bias=zeros, as in nn init).
        self.alpha = jnp.ones((features,), jnp.float32)
        self.bias = jnp.zeros((features,), jnp.float32)

    def __call__(self, x, sublayer, *, training=True, seed=0):
        # x: (batch, seq, d_model). Caller must vary `seed` across layers/steps.
        b, s, d = x.shape
        assert d == self.features
        x2d = x.reshape(b * s, d)
        normed = layer_norm(x2d, self.alpha, self.bias).reshape(b, s, d)
        # TODO(synk): `sublayer` is an arbitrary nn.Module in PyTorch; here it is any
        # JAX callable. If it is itself a Pallas matmul (attention/FFN projection),
        # fuse this dropout+residual into its output epilogue to save an HBM round trip.
        sub_out = sublayer(normed)
        out2d = residual_dropout_add(
            x2d, sub_out.reshape(b * s, d),
            seed=seed, p=self.p, training=training)
        return out2d.reshape(b, s, d)


# --------------------------- demo / self-check --------------------------------

if __name__ == "__main__":
    key = jax.random.PRNGKey(0)
    batch, seq, d_model = 2, 8, 32
    p_drop = 0.1

    kx, kw = jax.random.split(key)
    x = jax.random.normal(kx, (batch, seq, d_model), dtype=jnp.float32)

    # Deterministic example sublayer: a simple linear projection d_model->d_model.
    w = jax.random.normal(kw, (d_model, d_model), dtype=jnp.float32) * 0.02
    b = jnp.zeros((d_model,), jnp.float32)
    sublayer = lambda t: jnp.einsum("bsd,de->bse", t, w) + b

    block = ResidualConnection(features=d_model, dropout=p_drop)

    # Eval mode (dropout is identity) -> compare against a pure-JAX reference.
    out_eval = jax.block_until_ready(block(x, sublayer, training=False))

    mean = jnp.mean(x, axis=-1, keepdims=True)
    std = jnp.std(x, axis=-1, keepdims=True, ddof=1)
    normed_ref = 1.0 * (x - mean) / (std + EPS) + 0.0
    ref_eval = x + sublayer(normed_ref)
    assert jnp.allclose(out_eval, ref_eval, atol=1e-4, rtol=1e-4), "mismatch vs reference"

    # Training mode (exercises the in-kernel hash-PRNG dropout path).
    out_train = jax.block_until_ready(block(x, sublayer, training=True, seed=42))
    assert out_train.shape == (batch, seq, d_model)
    assert bool(jnp.all(jnp.isfinite(out_train)))
    # Dropped elements satisfy out == x exactly; fraction should be roughly p_drop.
    drop_frac = float(jnp.mean((out_train == x).astype(jnp.float32)))
    assert 0.0 < drop_frac < 0.5, f"unexpected dropout fraction {drop_frac}"

    print("KERNEL_OK")
</pallas_src>

<mosaic_0001>
module attributes {stable_mosaic.version = 11 : i64} {
  func.func @_layernorm_kernel(%arg0: i32, %arg1: memref<16x32xf32, #tpu.memory_space<vmem>>, %arg2: memref<1x32xf32, #tpu.memory_space<vmem>>, %arg3: memref<1x32xf32, #tpu.memory_space<vmem>>, %arg4: memref<16x32xf32, #tpu.memory_space<vmem>>) attributes {dimension_semantics = [#tpu.dimension_semantics<parallel>], iteration_bounds = array<i64: 1>, scalar_prefetch = 0 : i64, scratch_operands = 0 : i64, tpu.core_type = #tpu.core_type<tc>, window_params = [{transform_indices = @transform_0, window_bounds = array<i64: 16, 32>}, {pipeline_mode = #tpu.pipeline_mode<synchronous>, transform_indices = @transform_1, window_bounds = array<i64: 1, 32>}, {pipeline_mode = #tpu.pipeline_mode<synchronous>, transform_indices = @transform_2, window_bounds = array<i64: 1, 32>}, {transform_indices = @transform_3, window_bounds = array<i64: 16, 32>}]} {
    %c0 = arith.constant 0 : index
    %c0_0 = arith.constant 0 : index
    %0 = vector.load %arg1[%c0, %c0_0] : memref<16x32xf32, #tpu.memory_space<vmem>>, vector<16x32xf32>
    %cst = arith.constant dense<0.000000e+00> : vector<16xf32>
    %1 = vector.multi_reduction <add>, %0, %cst [1] : vector<16x32xf32> to vector<16xf32>
    %2 = vector.shape_cast %1 : vector<16xf32> to vector<16x1xf32>
    %cst_1 = arith.constant 3.200000e+01 : f32
    %3 = vector.broadcast %cst_1 : f32 to vector<16x1xf32>
    %4 = arith.divf %2, %3 : vector<16x1xf32>
    %5 = vector.broadcast %4 : vector<16x1xf32> to vector<16x32xf32>
    %6 = arith.subf %0, %5 : vector<16x32xf32>
    %7 = arith.mulf %6, %6 : vector<16x32xf32>
    %cst_2 = arith.constant dense<0.000000e+00> : vector<16xf32>
    %8 = vector.multi_reduction <add>, %7, %cst_2 [1] : vector<16x32xf32> to vector<16xf32>
    %9 = vector.shape_cast %8 : vector<16xf32> to vector<16x1xf32>
    %cst_3 = arith.constant 0.0322580636 : f32
    %10 = vector.broadcast %cst_3 : f32 to vector<16x1xf32>
    %11 = arith.mulf %9, %10 : vector<16x1xf32>
    %12 = math.sqrt %11 : vector<16x1xf32>
    %cst_4 = arith.constant 9.99999997E-7 : f32
    %13 = vector.broadcast %cst_4 : f32 to vector<16x1xf32>
    %14 = arith.addf %12, %13 : vector<16x1xf32>
    %cst_5 = arith.constant 1.000000e+00 : f32
    %15 = vector.broadcast %cst_5 : f32 to vector<16x1xf32>
    %16 = arith.divf %15, %14 : vector<16x1xf32>
    %c0_6 = arith.constant 0 : index
    %c0_7 = arith.constant 0 : index
    %17 = vector.load %arg2[%c0_6, %c0_7] : memref<1x32xf32, #tpu.memory_space<vmem>>, vector<1x32xf32>
    %18 = vector.broadcast %16 : vector<16x1xf32> to vector<16x32xf32>
    %19 = arith.mulf %6, %18 : vector<16x32xf32>
    %20 = vector.broadcast %17 : vector<1x32xf32> to vector<16x32xf32>
    %21 = arith.mulf %20, %19 : vector<16x32xf32>
    %c0_8 = arith.constant 0 : index
    %c0_9 = arith.constant 0 : index
    %22 = vector.load %arg3[%c0_8, %c0_9] : memref<1x32xf32, #tpu.memory_space<vmem>>, vector<1x32xf32>
    %23 = vector.broadcast %22 : vector<1x32xf32> to vector<16x32xf32>
    %24 = arith.addf %21, %23 : vector<16x32xf32>
    %c0_10 = arith.constant 0 : index
    %c0_11 = arith.constant 0 : index
    %25 = vector.load %arg4[%c0_10, %c0_11] : memref<16x32xf32, #tpu.memory_space<vmem>>, vector<16x32xf32>
    tpu.vector_store %arg4[%c0_10, %c0_11], %24 {strides = array<i32>} : memref<16x32xf32, #tpu.memory_space<vmem>>, vector<16x32xf32>,
    return
  }
  func.func @transform_0(%arg0: i32) -> (i32, i32) {
    %c0_i32 = arith.constant 0 : i32
    %c0_i32_0 = arith.constant 0 : i32
    return %arg0, %c0_i32 : i32, i32
  }
  func.func @transform_1(%arg0: i32) -> (i32, i32) {
    %c0_i32 = arith.constant 0 : i32
    %c0_i32_0 = arith.constant 0 : i32
    %c0_i32_1 = arith.constant 0 : i32
    return %c0_i32, %c0_i32_0 : i32, i32
  }
  func.func @transform_2(%arg0: i32) -> (i32, i32) {
    %c0_i32 = arith.constant 0 : i32
    %c0_i32_0 = arith.constant 0 : i32
    %c0_i32_1 = arith.constant 0 : i32
    return %c0_i32, %c0_i32_0 : i32, i32
  }
  func.func @transform_3(%arg0: i32) -> (i32, i32) {
    %c0_i32 = arith.constant 0 : i32
    %c0_i32_0 = arith.constant 0 : i32
    return %arg0, %c0_i32 : i32, i32
  }
}

</mosaic_0001>

<bundles_post_ra>
// kernel: tpu_custom_call.1
= control target key start
LH: loop header
LB: loop body
LE: loop exit
PB: predicated region body
PF: predicated region fallthrough
CT: control target
= control target key end

     0   :  { %8 = vsyncpa [#allocation3], 0  ;;  %s240_s0 = inlined_call_operand.hbm [shape: f32[16,32], index: 0, kind: input, shape index: {}]   ;;  %s241_s1 = inlined_call_operand.vmem [shape: f32[1,32], index: 1, kind: input, shape index: {}]   ;;  %s242_s2 = inlined_call_operand.vmem [shape: f32[1,32], index: 2, kind: input, shape index: {}]   ;;  %s243_s3 = inlined_call_operand.hbm [shape: f32[16,32], index: 3, kind: output, shape index: {}]  }
   0x1   :  { %9 = vsyncpa [#allocation4], 0  ;;  %s174_s12 = smov [#allocation2]   ;;  %s126_s16 = scalar_lea.hbm %s240_s0, 256 }
   0x2   :  { %s15_s13 = sshll.u32 %s174_s12, 4  ;;  %p127_p0 = scmp.ne.s32.totalorder %s240_s0, %s126_s16  ;;  %s16_s13 = int_to_ptr.vmem [resolvable:$true] %s15_s13 }
   0x3   :  { %p130_p1 = scmp.lt.u32.totalorder %s126_s16, %s240_s0 }
   0x5   :  { %p132_p2 = pnand %p130_p1, %p127_p0 }
   0x7   :  { %135 = shalt.err (!%p132_p2)
}
   0x8   :  { %s136_s21 = scalar_lea.vmem %s16_s13, 256  ;;  %p141_p4 = scmp.lt.s32.totalorder %s16_s13, %s16_s13 }
   0x9   :  { %p137_p3 = scmp.ne.s32.totalorder %s16_s13, %s136_s21  ;;  %p142_p5 = scmp.lt.s32.totalorder %s136_s21, %s136_s21 }
   0xb   :  { %p143_p6 = por %p142_p5, %p141_p4 }
   0xd   :  { %p144_p7 = pnand %p143_p6, %p137_p3 }
   0xf   :  { %147 = shalt.err (!%p144_p7)
}
  0x10   :  { %s175_s22 = smov 128   ;;  %s176_s23 = smov 8  }
  0x11   :  { %21 = dma.hbm_to_vmem [thread:$0]  %s240_s0, 256, %s16_s13, [#allocation3], %s175_s22, %s175_s22, %s176_s23  }
  0x12   :  { %170 = dma.done.wait [#allocation3], 256  }
  0x13   :  { %171 = vsyncadd [#allocation3], 4294967040  ;;  %vm31_vm0 = vcmask 261120   ;;  %v29_v0 = vld [vmem:[#allocation2] sm:$0xff]  ;;  %v30_v1 = vld [vmem:[#allocation2 + $0x8] sm:$0xff]  ;;  %s177_s29 = smov [#allocation5]  }
  0x14   :  { %v32_v2 = vsel %vm31_vm0, %v29_v0, 0.0  ;;  %v35_v3 = vsel %vm31_vm0, %v30_v1, 0.0  ;;  %v112_v31 = vld [vmem:[%s241_s1] ss:$0 sm:$0xff]  ;;  %s100_s30 = sshll.u32 %s177_s29, 4  ;;  %s101_s30 = int_to_ptr.vmem [resolvable:$true] %s100_s30 }
  0x15   :  { %33 = vadd.xlane.f32.xlu0 %v32_v2  ;;  %v113_v33 = vld [vmem:[%s242_s2] ss:$0 sm:$0xff]  ;;  %s148_s4 = scalar_lea.vmem %s101_s30, 256  ;;  %p153_p9 = scmp.lt.s32.totalorder %s101_s30, %s101_s30 }
  0x16   :  { %p149_p8 = scmp.ne.s32.totalorder %s101_s30, %s148_s4  ;;  %p154_p10 = scmp.lt.s32.totalorder %s148_s4, %s148_s4 }
  0x18   :  { %p155_p11 = por %p154_p10, %p153_p9 }
  0x19   :  { %36 = vadd.xlane.f32.xlu0 %v35_v3 }
  0x1a   :  { %p156_p12 = pnand %p155_p11, %p149_p8 }
  0xa2   :  { %v34_v4 = vpop.xlane.xlu0 %33 }
  0xa3   :  { %v39_v5 = vmul.f32 0.03125, %v34_v4 }
  0xa5   :  { %v41_v6 = vsub.f32 %v29_v0, %v39_v5 }
  0xa6   :  { %v37_v7 = vpop.xlane.xlu0 %36 }
  0xa7   :  { %v40_v8 = vmul.f32 0.03125, %v37_v7  ;;  %v43_v9 = vmul.f32 %v41_v6, %v41_v6 }
  0xa9   :  { %v42_v10 = vsub.f32 %v30_v1, %v40_v8  ;;  %v45_v11 = vsel %vm31_vm0, %v43_v9, 0.0 }
  0xaa   :  { %46 = vadd.xlane.f32.xlu1 %v45_v11 }
  0xab   :  { %v44_v12 = vmul.f32 %v42_v10, %v42_v10 }
  0xad   :  { %v48_v13 = vsel %vm31_vm0, %v44_v12, 0.0 }
  0xae   :  { %49 = vadd.xlane.f32.xlu1 %v48_v13 }
 0x137   :  { %v47_v14 = vpop.xlane.xlu1 %46 }
 0x138   :  { %v51_v15 = vmul.f32 0.032258064, %v47_v14 }
 0x13a   :  { %118 = vrsqrt.f32 %v51_v15  ;;  %vm55_vm1 = vcmp.eq.f32.partialorder %v51_v15, inf  ;;  %v58_v20 = vand.u32 2147483648, %v51_v15  ;;  %vm57_vm2 = vcmp.eq.f32.partialorder %v51_v15, 0.0 }
 0x13b   :  { %v50_v16 = vpop.xlane.xlu1 %49 }
 0x13c   :  { %v52_v17 = vmul.f32 0.032258064, %v50_v16 }
 0x13e   :  { %120 = vrsqrt.f32 %v52_v17  ;;  %vm62_vm3 = vcmp.eq.f32.partialorder %v52_v17, inf  ;;  %v65_v26 = vand.u32 2147483648, %v52_v17  ;;  %vm64_vm4 = vcmp.eq.f32.partialorder %v52_v17, 0.0 }
 0x144   :  { %v119_v18 = vpop.eup %118 }
 0x145   :  { %v54_v19 = vmul.f32 %v119_v18, %v51_v15 }
 0x147   :  { %v56_v21 = vsel %vm55_vm1, %v51_v15, %v54_v19 }
 0x148   :  { %v121_v22 = vpop.eup %120  ;;  %v59_v23 = vsel %vm57_vm2, %v58_v20, %v56_v21 }
 0x149   :  { %v67_v24 = vadd.f32 1e-06, %v59_v23  ;;  %v61_v25 = vmul.f32 %v121_v22, %v52_v17 }
 0x14b   :  { %122 = vrcp.f32 %v67_v24  ;;  %v63_v27 = vsel %vm62_vm3, %v52_v17, %v61_v25 }
 0x14c   :  { %v66_v28 = vsel %vm64_vm4, %v65_v26, %v63_v27 }
 0x14d   :  { %v68_v29 = vadd.f32 1e-06, %v66_v28 }
 0x14f   :  { %124 = vrcp.f32 %v68_v29 }
 0x155   :  { %v123_v30 = vpop.eup %122 }
 0x156   :  { %v74_v32 = vmul.f32 %v123_v30, %v41_v6 }
 0x158   :  { %v82_v34 = vmul.f32 %v112_v31, %v74_v32 }
 0x159   :  { %v125_v35 = vpop.eup %124 }
 0x15a   :  { %v75_v36 = vmul.f32 %v125_v35, %v42_v10  ;;  %v91_v37 = vadd.f32 %v113_v33, %v82_v34 }
 0x15c   :  { %v83_v38 = vmul.f32 %v112_v31, %v75_v36  ;;  %93 = vst.msk [vmem:[#allocation5] sm:$0xff] %vm31_vm0, %v91_v37 }
 0x15e   :  { %v92_v39 = vadd.f32 %v113_v33, %v83_v38 }
 0x160   :  { %94 = vst.msk [vmem:[#allocation5 + $0x8] sm:$0xff] %vm31_vm0, %v92_v39 }
 0x161   :  { %159 = shalt.err (!%p156_p12)
}
 0x162   :  { %s160_s5 = scalar_lea.hbm %s243_s3, 256 }
 0x163   :  { %p161_p13 = scmp.ne.s32.totalorder %s243_s3, %s160_s5  ;;  %p164_p0 = scmp.lt.u32.totalorder %s160_s5, %s243_s3 }
 0x165   :  { %p166_p1 = pnand %p164_p0, %p161_p13 }
 0x167   :  { %169 = shalt.err (!%p166_p1)
}
 0x168   :  { %106 = dma.vmem_to_hbm [thread:$0]  %s101_s30, 256, %s243_s3, [#allocation4], %s175_s22, %s175_s22, %s176_s23  }
 0x169   :  { %172 = dma.done.wait [#allocation4], 256  }
 0x16a   :  { %173 = vsyncadd [#allocation4], 4294967040 }
 0x16b   :  { %110 = vsyncpa [#allocation3], 1 }
 0x16c   :  { %111 = vsyncpa [#allocation4], 1 }

</bundles_post_ra>
